<compile_context>
chip_gen: v6e
topology: v6e:2x2x1
jax: 0.10.0
libtpu: 0.0.40
codegen_flags: <defaults>
</compile_context>

<pallas_src>
import functools

import jax
import jax.numpy as jnp
from jax import lax
from jax.experimental import pallas as pl
from jax.experimental.pallas import tpu as pltpu


# --------------------------- 'time' (HiddenLayer) path --------------------------- #

def _time_embedding_kernel(*refs, has_mask: bool, has_bias: bool):
    it = iter(refs)
    x_ref = next(it)
    mask_ref = next(it) if has_mask else None
    w_ref = next(it)
    b_ref = next(it) if has_bias else None
    o_ref = next(it)

    # MXU matmul with f32 accumulation (inputs may be bf16).
    y = jnp.dot(x_ref[...], w_ref[...], preferred_element_type=jnp.float32)
    # Mask is a per-row scalar and the activation is identity, so applying it AFTER
    # the matmul is exact and cuts VPU work from TM*V to TM*E multiplies.
    if has_mask:
        y = y * mask_ref[...]                 # (TM, 1) lane-broadcast, f32 epilogue
    if has_bias:
        y = y + b_ref[...]                    # (1, E) broadcast, f32 epilogue
    o_ref[...] = y.astype(o_ref.dtype)


def time_embedding(x, weight, bias=None, input_mask=None, *, tm=1024, use_bf16=True):
    """embedding_type='time': identity(Linear(x * mask)).

    x: (B, S, V) float32; weight: (V, E); bias: (E,) or None;
    input_mask: (B, S) / (B, S, 1) or None. Returns (B, S, E) float32.
    """
    B, S, V = x.shape
    E = weight.shape[1]
    M = B * S
    has_mask = input_mask is not None
    has_bias = bias is not None

    # bf16 MXU inputs (f32 accumulation via preferred_element_type): halves x/weight
    # DMA bytes and their VMEM double-buffers, ~2x MXU throughput. Mask/bias epilogue
    # stays in f32 (v5e has no bf16 VALU). In production, upstream ops should emit
    # bf16 directly so this cast fuses away.
    in_dtype = jnp.bfloat16 if use_bf16 else jnp.float32
    in_bytes = 2 if use_bf16 else 4
    x2 = x.reshape(M, V).astype(in_dtype)
    w = weight.astype(in_dtype)

    # ---- tile-size / VMEM budget derivation (v7x-safe: 64 MiB physical VMEM) ----
    TM = min(tm, M)
    if TM < M:
        TM = max(8, (TM // 8) * 8)            # sublane-aligned partial tiles

    resident = 2 * V * E * in_bytes + (2 * E * 4 if has_bias else 0)

    def _tile_bytes(t):
        b = 2 * t * V * in_bytes              # x double-buffer
        b += 2 * t * E * 4                    # out double-buffer (f32)
        if has_mask:
            b += 2 * t * 4                    # (t, 1) mask column
        return b

    budget = 48 * 1024 * 1024                 # conservative; fits all generations
    while TM > 8 and resident + _tile_bytes(TM) > budget:
        TM = max(8, ((TM // 2) // 8) * 8)
    # TODO(synk): if the resident weight alone blows the budget (huge V*E), add a
    # reduction grid axis over V (f32 VMEM accumulator, pl.when init/finalize) and
    # tile E; not needed for typical embedding sizes.

    vmem_limit = int(max(32 * 1024 * 1024, resident + _tile_bytes(TM) + (2 << 20)))
    vmem_limit = min(vmem_limit, 100 * 1024 * 1024)

    grid = (pl.cdiv(M, TM),)
    inputs = [x2]
    in_specs = [pl.BlockSpec((TM, V), lambda i: (i, 0))]

    if has_mask:
        # Keep the mask as an (M, 1) column: no (M, V) broadcast in HBM.
        m2 = jnp.reshape(input_mask.astype(jnp.float32), (M, 1))
        inputs.append(m2)
        in_specs.append(pl.BlockSpec((TM, 1), lambda i: (i, 0)))

    # Weight/bias are resident: constant index_map -> DMA'd once, no refetch across
    # grid steps. (pipeline_mode=pl.Buffered(1) would additionally halve their VMEM
    # footprint for very large V*E.)
    inputs.append(w)
    in_specs.append(pl.BlockSpec((V, E), lambda i: (0, 0)))
    if has_bias:
        inputs.append(bias.reshape(1, E).astype(jnp.float32))
        in_specs.append(pl.BlockSpec((1, E), lambda i: (0, 0)))

    bytes_accessed = (M * V * in_bytes + V * E * in_bytes + M * E * 4
                      + (M * 4 if has_mask else 0) + (E * 4 if has_bias else 0))
    cost = pl.CostEstimate(flops=2 * M * V * E, transcendentals=0,
                           bytes_accessed=bytes_accessed)

    kernel = functools.partial(_time_embedding_kernel,
                               has_mask=has_mask, has_bias=has_bias)

    out = pl.pallas_call(
        kernel,
        out_shape=jax.ShapeDtypeStruct((M, E), jnp.float32),
        grid=grid,
        in_specs=in_specs,
        out_specs=pl.BlockSpec((TM, E), lambda i: (i, 0)),
        compiler_params=pltpu.CompilerParams(
            dimension_semantics=("parallel",),     # megacore sharding on v7x
            vmem_limit_bytes=vmem_limit,           # shape-derived, not a fixed cap
        ),
        cost_estimate=cost,
    )(*inputs)
    return out.reshape(B, S, E)


# --------------------------- 'category' (lookup) path ---------------------------- #

def _category_gather_kernel(ids_ref, table_ref, o_ref, *, tg: int, n_tokens: int):
    # Table is VMEM-resident; ids are in SMEM (scalar prefetch). Gather TG rows per
    # grid step into a dense (TG, E) output block: no per-token grid step, no
    # per-token HBM DMA, dense HBM writeback.
    base = pl.program_id(0) * tg
    n_rows = table_ref.shape[0]

    def body(g, carry):
        tok = jnp.minimum(base + g, n_tokens - 1)        # clamp padded tail rows
        idx = jnp.clip(ids_ref[tok], 0, n_rows - 1)      # clamp out-of-range ids
        o_ref[pl.ds(g, 1), :] = table_ref[pl.ds(idx, 1), :]
        return carry

    lax.fori_loop(0, tg, body, 0)


def category_embedding(ids, table, *, tg=256):
    """embedding_type='category': nn.Embedding lookup.

    ids: (B, S) int32 token indices; table: (V, E). Returns (B, S, E).
    Note: out-of-range ids are clamped (torch raises); in-range ids match exactly.
    """
    B, S = ids.shape
    V, E = table.shape
    M = B * S
    ids_flat = ids.reshape(M).astype(jnp.int32)

    TG = min(tg, M)
    if TG < M:
        TG = max(8, (TG // 8) * 8)
    grid = (pl.cdiv(M, TG),)

    # TODO(synk): for tables too large for VMEM, switch to a manual make_async_copy
    # row gather (memory_space=pl.ANY table + DMA-semaphore slab, G rows per step);
    # typical num_embeddings for this module keeps V*E*4 well inside VMEM.
    itemsize = table.dtype.itemsize
    vmem_limit = int(max(32 * 1024 * 1024,
                         2 * V * E * itemsize + 2 * TG * E * itemsize + (1 << 20)))
    vmem_limit = min(vmem_limit, 100 * 1024 * 1024)

    kernel = functools.partial(_category_gather_kernel, tg=TG, n_tokens=M)

    out = pl.pallas_call(
        kernel,
        out_shape=jax.ShapeDtypeStruct((M, E), table.dtype),
        grid_spec=pltpu.PrefetchScalarGridSpec(
            num_scalar_prefetch=1,                       # ids -> SMEM
            grid=grid,
            in_specs=[pl.BlockSpec((V, E), lambda i, ids: (0, 0))],   # resident table
            out_specs=pl.BlockSpec((TG, E), lambda i, ids: (i, 0)),   # dense tiles
        ),
        compiler_params=pltpu.CompilerParams(
            dimension_semantics=("parallel",),           # shard across v7x's 2 TCs
            vmem_limit_bytes=vmem_limit,
        ),
    )(ids_flat, table)
    return out.reshape(B, S, E)


# ------------------------------- demo / check ------------------------------------ #

if __name__ == "__main__":
    key = jax.random.PRNGKey(0)
    k_x, k_w, k_t, k_ids, k_mask, k_b = jax.random.split(key, 6)

    # Module hyperparameters (small, consistent with the module's __init__).
    num_embeddings = 16   # V : in_features for 'time', vocab size for 'category'
    embedding_dim = 32    # E
    batch, seq = 2, 8

    # ---- embedding_type='time' (default path): masked linear ----
    x = jax.random.normal(k_x, (batch, seq, num_embeddings), jnp.float32)
    weight = (jax.random.normal(k_w, (num_embeddings, embedding_dim), jnp.float32)
              * (1.0 / jnp.sqrt(num_embeddings)))
    input_mask = (jax.random.uniform(k_mask, (batch, seq)) > 0.3).astype(jnp.float32)
    bias = jax.random.normal(k_b, (embedding_dim,), jnp.float32)

    # (a) mask present, no bias (module default bias=False) — bf16 MXU path.
    out_time = jax.block_until_ready(
        time_embedding(x, weight, bias=None, input_mask=input_mask))
    x_r = x.astype(jnp.bfloat16).astype(jnp.float32)
    w_r = weight.astype(jnp.bfloat16).astype(jnp.float32)
    ref_time = jnp.einsum("bsv,ve->bse", x_r, w_r) * input_mask[..., None]
    assert out_time.shape == (batch, seq, embedding_dim)
    assert jnp.allclose(out_time, ref_time, atol=1e-3, rtol=1e-3)

    # (b) no mask, with bias, exact f32 path (exercises optional-input code paths).
    out_time_b = jax.block_until_ready(
        time_embedding(x, weight, bias=bias, input_mask=None, use_bf16=False))
    ref_time_b = jnp.einsum("bsv,ve->bse", x, weight) + bias
    assert jnp.allclose(out_time_b, ref_time_b, atol=1e-5, rtol=1e-5)

    # ---- embedding_type='category': table lookup from VMEM-resident table ----
    table = jax.random.normal(k_t, (num_embeddings, embedding_dim), jnp.float32)
    ids = jax.random.randint(k_ids, (batch, seq), 0, num_embeddings, jnp.int32)

    out_cat = jax.block_until_ready(category_embedding(ids, table))
    ref_cat = table[ids]
    assert out_cat.shape == (batch, seq, embedding_dim)
    assert jnp.allclose(out_cat, ref_cat, atol=1e-6)

    # TODO(synk): dropout_p>0 / weight_reg, weight_norm penalty terms are
    # training-time extras of HiddenLayer (defaults dropout_p=0.0), not part of the
    # forward pass, so omitted.
    print("KERNEL_OK")
</pallas_src>

<mosaic_0001>
module attributes {stable_mosaic.version = 11 : i64} {
  func.func @_time_embedding_kernel(%arg0: i32, %arg1: memref<16x16xbf16, #tpu.memory_space<vmem>>, %arg2: memref<16x1xf32, #tpu.memory_space<vmem>>, %arg3: memref<16x32xbf16, #tpu.memory_space<vmem>>, %arg4: memref<16x32xf32, #tpu.memory_space<vmem>>) attributes {dimension_semantics = [#tpu.dimension_semantics<parallel>], iteration_bounds = array<i64: 1>, scalar_prefetch = 0 : i64, scratch_operands = 0 : i64, tpu.core_type = #tpu.core_type<tc>, window_params = [{transform_indices = @transform_0, window_bounds = array<i64: 16, 16>}, {transform_indices = @transform_1, window_bounds = array<i64: 16, 1>}, {pipeline_mode = #tpu.pipeline_mode<synchronous>, transform_indices = @transform_2, window_bounds = array<i64: 16, 32>}, {transform_indices = @transform_3, window_bounds = array<i64: 16, 32>}]} {
    %c0 = arith.constant 0 : index
    %c0_0 = arith.constant 0 : index
    %0 = vector.load %arg1[%c0, %c0_0] : memref<16x16xbf16, #tpu.memory_space<vmem>>, vector<16x16xbf16>
    %c0_1 = arith.constant 0 : index
    %c0_2 = arith.constant 0 : index
    %1 = vector.load %arg3[%c0_1, %c0_2] : memref<16x32xbf16, #tpu.memory_space<vmem>>, vector<16x32xbf16>
    %cst = arith.constant dense<0.000000e+00> : vector<16x32xf32>
    %2 = tpu.matmul %0, %1, %cst {dimension_numbers = #tpu.dot_dimension_numbers<[1], [0], [0], [1], [0, 0, 1, 1], [], []>} : vector<16x16xbf16>, vector<16x32xbf16>, vector<16x32xf32> -> vector<16x32xf32>
    %c0_3 = arith.constant 0 : index
    %c0_4 = arith.constant 0 : index
    %3 = vector.load %arg2[%c0_3, %c0_4] : memref<16x1xf32, #tpu.memory_space<vmem>>, vector<16x1xf32>
    %4 = vector.broadcast %3 : vector<16x1xf32> to vector<16x32xf32>
    %5 = arith.mulf %2, %4 : vector<16x32xf32>
    %c0_5 = arith.constant 0 : index
    %c0_6 = arith.constant 0 : index
    %6 = vector.load %arg4[%c0_5, %c0_6] : memref<16x32xf32, #tpu.memory_space<vmem>>, vector<16x32xf32>
    tpu.vector_store %arg4[%c0_5, %c0_6], %5 {strides = array<i32>} : memref<16x32xf32, #tpu.memory_space<vmem>>, vector<16x32xf32>,
    return
  }
  func.func @transform_0(%arg0: i32) -> (i32, i32) {
    %c0_i32 = arith.constant 0 : i32
    %c0_i32_0 = arith.constant 0 : i32
    return %arg0, %c0_i32 : i32, i32
  }
  func.func @transform_1(%arg0: i32) -> (i32, i32) {
    %c0_i32 = arith.constant 0 : i32
    %c0_i32_0 = arith.constant 0 : i32
    return %arg0, %c0_i32 : i32, i32
  }
  func.func @transform_2(%arg0: i32) -> (i32, i32) {
    %c0_i32 = arith.constant 0 : i32
    %c0_i32_0 = arith.constant 0 : i32
    %c0_i32_1 = arith.constant 0 : i32
    return %c0_i32, %c0_i32_0 : i32, i32
  }
  func.func @transform_3(%arg0: i32) -> (i32, i32) {
    %c0_i32 = arith.constant 0 : i32
    %c0_i32_0 = arith.constant 0 : i32
    return %arg0, %c0_i32 : i32, i32
  }
}

</mosaic_0001>

<bundles_post_ra>
// kernel: tpu_custom_call.1
= control target key start
LH: loop header
LB: loop body
LE: loop exit
PB: predicated region body
PF: predicated region fallthrough
CT: control target
= control target key end

     0   :  { %v151_v1 = vmov 0.0   ;;  %vm152_vm0 = vmmov 0   ;;  %vm31_vm1 = vcmask 130048   ;;  %s192_s0 = inlined_call_operand.vmem [shape: bf16[16,16], index: 0, kind: input, shape index: {}]   ;;  %s193_s1 = inlined_call_operand.vmem [shape: f32[16,1], index: 1, kind: input, shape index: {}]   ;;  %s194_s2 = inlined_call_operand.vmem [shape: bf16[16,32], index: 2, kind: input, shape index: {}]   ;;  %s195_s3 = inlined_call_operand.hbm [shape: f32[16,32], index: 3, kind: output, shape index: {}]  }
   0x1   :  { %v127_v0 = vld [vmem:[%s194_s2] sm:$0xff]   ;;  %114 = vmatprep.subr.bf16.mxu0 %v151_v1  ;;  %116 = vmatprep.mubr.msk.bf16.mxu0 %vm152_vm0, %v151_v1 }
   0x2   :  { %v128_v2 = vld [vmem:[%s192_s0] sm:$0xff]   ;;  %115 = vmatpush3.bf16.msra.mxu0 %v127_v0 }
   0x3   :  { %v76_v3 = vld [vmem:[%s193_s1] sm:$0xff] }
   0x4   :  { %8 = vsyncpa [#allocation3], 0  ;;  %v153_v4 = vmov 0   ;;  %v77_v5 = vld [vmem:[%s193_s1 + $0x8] sm:$0xff]  ;;  %vm90_vm2 = vcmask 261120   ;;  %s154_s0 = smov [#allocation2]  }
   0x5   :  { %126 = vset.pattern.permute.xlu0 %v153_v4  ;;  %117 = vmatmul.mubr.msk.bf16.vlgmr.msra.gmra.mxu0 %vm31_vm1, %v128_v2  ;;  %s98_s19 = sshll.u32 %s154_s0, 4  ;;  %s99_s19 = int_to_ptr.vmem [resolvable:$true] %s98_s19 }
   0x6   :  { %80 = vperm.xlu0 %126, %v76_v3   ;;  %s129_s20 = scalar_lea.vmem %s99_s19, 256  ;;  %p134_p1 = scmp.lt.s32.totalorder %s99_s19, %s99_s19 }
   0x7   :  { %p130_p0 = scmp.ne.s32.totalorder %s99_s19, %s129_s20  ;;  %p135_p2 = scmp.lt.s32.totalorder %s129_s20, %s129_s20 }
   0x9   :  { %p136_p3 = por %p135_p2, %p134_p1 }
   0xa   :  { %85 = vperm.xlu0 %126, %v77_v5  }
   0xb   :  { %p137_p4 = pnand %p136_p3, %p130_p0 }
  0x81   :  { %v81_v6 = vpop.permute.xlu0 %80 }
  0x85   :  { %v86_v10 = vpop.permute.xlu0 %85 }
  0xc5   :  { %v69_v7 = vpop.f32.mrf.mxu0 }
  0xc6   :  { %v88_v8 = vmul.f32 %v81_v6, %v69_v7 }
  0xc7   :  { %v118_v9 = vpop.f32.mrf.mxu0 }
  0xc8   :  { %91 = vst.msk [vmem:[#allocation2] sm:$0xff] %vm90_vm2, %v88_v8 }
  0xc9   :  { %v72_v11 = vpop.f32.mrf.mxu0 }
  0xca   :  { %v89_v12 = vmul.f32 %v86_v10, %v72_v11 }
  0xcb   :  { %v119_v13 = vpop.f32.mrf.mxu0 }
  0xcc   :  { %92 = vst.msk [vmem:[#allocation2 + $0x8] sm:$0xff] %vm90_vm2, %v89_v12 }
  0xcd   :  { %140 = shalt.err (!%p137_p4)
}
  0xce   :  { %s155_s1 = smov 128   ;;  %s156_s21 = smov 8  }
  0xcf   :  { %104 = dma.vmem_to_hbm [thread:$0]  %s99_s19, 256, %s195_s3, [#allocation3], %s155_s1, %s155_s1, %s156_s21  }
  0xd0   :  { %149 = dma.done.wait [#allocation3], 256  }
  0xd1   :  { %150 = vsyncadd [#allocation3], 4294967040 }
  0xd2   :  { %108 = vsyncpa [#allocation3], 1 }

</bundles_post_ra>
